<compile_context>
chip_gen: v6e
topology: v6e:2x2x1
jax: 0.10.0
libtpu: 0.0.40
codegen_flags: <defaults>
</compile_context>

<pallas_src>
import jax
import jax.numpy as jnp
from jax.experimental import pallas as pl
from jax.experimental.pallas import tpu as pltpu


def modulation_kernel(x_ref, wcs_ref, bc_ref, o_ref):
    # x_ref:   (1, C, THW)  activation tile, lane dim = spatial
    # wcs_ref: (1, O, C)    per-batch pre-scaled 1x1 conv weight (cond folded in)
    # bc_ref:  (O, 1)       conv bias
    # o_ref:   (1, O, THW)
    out = jnp.dot(wcs_ref[0], x_ref[0],
                  preferred_element_type=jnp.float32)       # (O, THW), K = C
    o_ref[0] = (out + bc_ref[...]).astype(o_ref.dtype)      # bias broadcast over lanes


def _round_up(x: int, m: int) -> int:
    return ((x + m - 1) // m) * m


def _vmem_budget_bytes() -> int:
    """Generation-aware VMEM budget for this kernel's buffers."""
    try:
        cap = pltpu.get_tpu_info().vmem_capacity_bytes
    except Exception:
        cap = 64 << 20  # conservative fallback (assume v7x-like 64 MiB)
    if cap >= (100 << 20):      # v5e / v6e: 128 MiB physical -> allow up to 64 MiB
        return 64 << 20
    return 32 << 20             # v7x: 64 MiB physical, 2 TCs share the chip


def modulation_pallas(x_nchw, cond, w_lin, b_lin, w_conv, b_conv, *, max_tile_hw=8192):
    """x_nchw: [B, C, H, W], cond: [B, Ncond].
    w_lin: [C, Ncond] (torch Linear.weight), b_lin: [C]
    w_conv: [O, C, 1, 1] (torch Conv2d.weight), b_conv: [O]
    Returns: [B, O, H, W]
    """
    B, C, H, W = x_nchw.shape
    O = w_conv.shape[0]
    HW = H * W
    itemsize = jnp.dtype(x_nchw.dtype).itemsize

    # --- Hoisted scalar-ish work (tiny XLA ops, removes all per-step VPU prologue) ---
    cond_lin = cond @ w_lin.T + b_lin                         # [B, C]
    wc = w_conv.reshape(O, C)                                 # [O, C] (torch layout)
    wc_scaled = wc[None, :, :] * cond_lin[:, None, :]         # [B, O, C], exact reassociation
    bc = b_conv.reshape(O, 1)                                 # [O, 1]
    x_r = x_nchw.reshape(B, C, HW)                            # pure reshape, no transpose

    # --- Tile sizing: biggest lane tile that fits the generation-aware VMEM budget ---
    vmem_budget = _vmem_budget_bytes()
    c_pad = max(_round_up(C, 8), 8)                           # sublane-padded C for x tile
    # Resident params, lane/sublane padded, double-buffered:
    param_bytes = 2 * itemsize * (O * max(_round_up(C, 128), 128)   # wc_scaled block
                                  + O * 128)                        # bias block
    per_lane_bytes = 2 * itemsize * (c_pad + O)               # x + out tiles, double-buffered
    thw_cap = max(((vmem_budget - param_bytes) // per_lane_bytes) // 128 * 128, 128)

    thw = min(_round_up(HW, 128), max_tile_hw, thw_cap)
    n_hw = pl.cdiv(HW, thw)

    # Megacore (v7x): ensure >= 2 grid steps along a parallel axis.
    if B * n_hw < 2 and HW > 128:
        thw = _round_up(pl.cdiv(HW, 2), 128)
        n_hw = pl.cdiv(HW, thw)

    vmem_limit = int(min(max(param_bytes + per_lane_bytes * thw + (4 << 20), 8 << 20),
                         vmem_budget))

    out = pl.pallas_call(
        modulation_kernel,
        out_shape=jax.ShapeDtypeStruct((B, O, HW), x_nchw.dtype),
        grid_spec=pltpu.PrefetchScalarGridSpec(
            num_scalar_prefetch=0,
            grid=(B, n_hw),
            in_specs=[
                pl.BlockSpec((1, C, thw), lambda b, t: (b, 0, t)),   # x tile
                pl.BlockSpec((1, O, C), lambda b, t: (b, 0, 0)),     # pre-scaled weight / batch
                pl.BlockSpec((O, 1), lambda b, t: (0, 0)),           # conv bias (const)
            ],
            out_specs=pl.BlockSpec((1, O, thw), lambda b, t: (b, 0, t)),
        ),
        compiler_params=pltpu.CompilerParams(
            dimension_semantics=("parallel", "parallel"),
            vmem_limit_bytes=vmem_limit),
    )(x_r, wc_scaled, bc)

    return out.reshape(B, O, H, W)


def modulation_ref(x_nchw, cond, w_lin, b_lin, w_conv, b_conv):
    """Pure-JAX reference mirroring the PyTorch forward."""
    cond_lin = cond @ w_lin.T + b_lin                    # [B, C]
    modulated = x_nchw * cond_lin[:, :, None, None]      # [B, C, H, W]
    O, C = w_conv.shape[0], w_conv.shape[1]
    y = jnp.einsum("bchw,oc->bohw", modulated, w_conv.reshape(O, C))
    return y + b_conv[None, :, None, None]


if __name__ == "__main__":
    # Module config (compressed=True -> conv out channels = 256)
    B, C, H, W = 2, 4, 16, 16
    Ncond = 8
    O = 256

    key = jax.random.PRNGKey(0)
    k1, k2, k3, k4, k5, k6 = jax.random.split(key, 6)

    x = jax.random.normal(k1, (B, C, H, W), dtype=jnp.float32)
    cond = jax.random.normal(k2, (B, Ncond), dtype=jnp.float32)

    # Deterministic parameter init (shapes follow nn.Linear / nn.Conv2d 1x1).
    w_lin = jax.random.normal(k3, (C, Ncond), dtype=jnp.float32) * 0.1
    b_lin = jax.random.normal(k4, (C,), dtype=jnp.float32) * 0.1
    w_conv = jax.random.normal(k5, (O, C, 1, 1), dtype=jnp.float32) * 0.1
    b_conv = jax.random.normal(k6, (O,), dtype=jnp.float32) * 0.1

    y = modulation_pallas(x, cond, w_lin, b_lin, w_conv, b_conv)
    y = jax.block_until_ready(y)

    y_ref = modulation_ref(x, cond, w_lin, b_lin, w_conv, b_conv)
    assert y.shape == (B, O, H, W)
    assert jnp.allclose(y, y_ref, atol=1e-4, rtol=1e-4)

    print("KERNEL_OK")
</pallas_src>

<mosaic_0001>
module attributes {stable_mosaic.version = 11 : i64} {
  func.func @modulation_kernel(%arg0: i32, %arg1: i32, %arg2: memref<1x4x256xf32, #tpu.memory_space<vmem>>, %arg3: memref<1x256x4xf32, #tpu.memory_space<vmem>>, %arg4: memref<256x1xf32, #tpu.memory_space<vmem>>, %arg5: memref<1x256x256xf32, #tpu.memory_space<vmem>>) attributes {dimension_semantics = [#tpu.dimension_semantics<parallel>, #tpu.dimension_semantics<parallel>], iteration_bounds = array<i64: 2, 1>, scalar_prefetch = 0 : i64, scratch_operands = 0 : i64, tpu.core_type = #tpu.core_type<tc>, window_params = [{transform_indices = @transform_0, window_bounds = array<i64: 1, 4, 256>}, {transform_indices = @transform_1, window_bounds = array<i64: 1, 256, 4>}, {pipeline_mode = #tpu.pipeline_mode<synchronous>, transform_indices = @transform_2, window_bounds = array<i64: 256, 1>}, {transform_indices = @transform_3, window_bounds = array<i64: 1, 256, 256>}]} {
    %c0 = arith.constant 0 : index
    %c0_0 = arith.constant 0 : index
    %c0_1 = arith.constant 0 : index
    %0 = vector.load %arg3[%c0, %c0_0, %c0_1] : memref<1x256x4xf32, #tpu.memory_space<vmem>>, vector<1x256x4xf32>
    %1 = vector.shape_cast %0 : vector<1x256x4xf32> to vector<256x4xf32>
    %c0_2 = arith.constant 0 : index
    %c0_3 = arith.constant 0 : index
    %c0_4 = arith.constant 0 : index
    %2 = vector.load %arg2[%c0_2, %c0_3, %c0_4] : memref<1x4x256xf32, #tpu.memory_space<vmem>>, vector<1x4x256xf32>
    %3 = vector.shape_cast %2 : vector<1x4x256xf32> to vector<4x256xf32>
    %cst = arith.constant dense<0.000000e+00> : vector<256x256xf32>
    %4 = tpu.matmul %1, %3, %cst {dimension_numbers = #tpu.dot_dimension_numbers<[1], [0], [0], [1], [0, 0, 1, 1], [], []>} : vector<256x4xf32>, vector<4x256xf32>, vector<256x256xf32> -> vector<256x256xf32>
    %c0_5 = arith.constant 0 : index
    %c0_6 = arith.constant 0 : index
    %5 = vector.load %arg4[%c0_5, %c0_6] : memref<256x1xf32, #tpu.memory_space<vmem>>, vector<256x1xf32>
    %6 = vector.broadcast %5 : vector<256x1xf32> to vector<256x256xf32>
    %7 = arith.addf %4, %6 : vector<256x256xf32>
    %c0_7 = arith.constant 0 : index
    %c0_8 = arith.constant 0 : index
    %c0_9 = arith.constant 0 : index
    %8 = vector.load %arg5[%c0_7, %c0_8, %c0_9] : memref<1x256x256xf32, #tpu.memory_space<vmem>>, vector<1x256x256xf32>
    %9 = vector.shape_cast %8 : vector<1x256x256xf32> to vector<256x256xf32>
    %10 = vector.shape_cast %7 : vector<256x256xf32> to vector<1x256x256xf32>
    tpu.vector_store %arg5[%c0_7, %c0_8, %c0_9], %10 {strides = array<i32>} : memref<1x256x256xf32, #tpu.memory_space<vmem>>, vector<1x256x256xf32>,
    return
  }
  func.func @transform_0(%arg0: i32, %arg1: i32) -> (i32, i32, i32) {
    %c0_i32 = arith.constant 0 : i32
    %c0_i32_0 = arith.constant 0 : i32
    return %arg0, %c0_i32, %arg1 : i32, i32, i32
  }
  func.func @transform_1(%arg0: i32, %arg1: i32) -> (i32, i32, i32) {
    %c0_i32 = arith.constant 0 : i32
    %c0_i32_0 = arith.constant 0 : i32
    %c0_i32_1 = arith.constant 0 : i32
    return %arg0, %c0_i32, %c0_i32_0 : i32, i32, i32
  }
  func.func @transform_2(%arg0: i32, %arg1: i32) -> (i32, i32) {
    %c0_i32 = arith.constant 0 : i32
    %c0_i32_0 = arith.constant 0 : i32
    %c0_i32_1 = arith.constant 0 : i32
    return %c0_i32, %c0_i32_0 : i32, i32
  }
  func.func @transform_3(%arg0: i32, %arg1: i32) -> (i32, i32, i32) {
    %c0_i32 = arith.constant 0 : i32
    %c0_i32_0 = arith.constant 0 : i32
    return %arg0, %c0_i32, %arg1 : i32, i32, i32
  }
}

</mosaic_0001>

<bundles_post_ra>
// kernel: tpu_custom_call.1
= control target key start
LH: loop header
LB: loop body
LE: loop exit
PB: predicated region body
PF: predicated region fallthrough
CT: control target
= control target key end

     0   :  { %8 = vsyncpa [#allocation3], 0  ;;  %s1630_s0 = inlined_call_operand.vmem [shape: f32[2,4,256], index: 0, kind: input, shape index: {}]   ;;  %s1631_s1 = inlined_call_operand.vmem [shape: f32[2,256,4], index: 1, kind: input, shape index: {}]   ;;  %s1632_s2 = inlined_call_operand.vmem [shape: f32[256,1], index: 2, kind: input, shape index: {}]   ;;  %s1633_s3 = inlined_call_operand.hbm [shape: f32[2,256,256], index: 3, kind: output, shape index: {}]  }
   0x1   :  { %10 = vsyncpa [#allocation3 + $0x1], 0  ;;  %s1196_s12 = smov 0   ;;  %s1198_s13 = smov 0  }
   0x2   :  { %s1200_s14 = smov 0   ;;  %s1202_s15 = smov 0  }
   0x3   :  { %s1204_s16 = smov 0   ;;  %s1206_s17 = smov 0  }
   0x4 LB: > { %s977_s18 = sadd.s32 4294967295, %s1169_s17   ;;  %s978_s19 = sadd.s32 4294967294, %s1169_s17   ;;  %s1169_s17 = sphi %s1206_s17, %s16_s17   ;;  %s1165_s16 = sphi %s1204_s16, %s1640_s16   ;;  %s1161_s15 = sphi %s1202_s15, %s1639_s15   ;;  %s1157_s14 = sphi %s1200_s14, %s1638_s14   ;;  %s1153_s13 = sphi %s1198_s13, %s1637_s13   ;;  %s1149_s12 = sphi %s1196_s12, %s1636_s12  }
   0x5   : > { %s28_s20 = sadd.s32 1, %s1165_s16  ;;  %s112_s21 = sadd.s32 1, %s1157_s14 }
   0x6   : > { %p30_p0 = scmp.ge.s32.totalorder %s28_s20, 2  ;;  %p122_p1 = scmp.ne.s32.totalorder %s1157_s14, %s1153_s13 }
   0x7   : > { %p123_p2 = scmp.eq.s32.totalorder %s977_s18, 1  ;;  %p128_p3 = scmp.ne.s32.totalorder %s1153_s13, %s1149_s12 }
   0x8   : > { %s1642_s20 = smov (%p30_p0, %s28_s20), 0  ;;  %p129_p5 = scmp.eq.s32.totalorder %s978_s19, 1 }
   0x9   : > { %p1236_p4 = por %p123_p2, %p122_p1  ;;  %s107_s23 = ssub.s32 %s1165_s16, %s1642_s20 }
   0xa   : > { %p981_p6 = scmp.ge.s32.totalorder %s1169_s17, 1  ;;  %p110_p7 = scmp.eq.s32.totalorder %s107_s23, 0 }
   0xb   : > { %p1243_p8 = por %p129_p5, %p128_p3  ;;  %p171_p9 = scmp.lt.s32.totalorder %s1169_s17, 3 }
   0xc   : > { %s1249_s25 = scalar_select %p110_p7, %s1157_s14, %s112_s21  }
   0xd   : > { %p172_p10 = pnand %p981_p6, %p171_p9 }
   0xe   : > { %p205_p11 = scmp.lt.s32.totalorder (!%p172_p10), %s1161_s15, 1  ;;  %s1028_s9 = sshll.u32 (!%p172_p10), %s1161_s15, 13 }
   0xf   : > { %175 = sbr.rel (%p172_p10) target bundleno = 301 (0x12d), region = 32  ;;  %s1574_s19 = scalar_lea.hbm (!%p172_p10), %s1633_s3, %s1028_s9 }
  0x10   : > { %s1173_s26 = smov (!%p172_p10), [#allocation2]  }
  0x11   : > { %s1097_s27 = sshll.u32 (!%p172_p10), %s1173_s26, 4  ;;  %s1098_s27 = int_to_ptr.vmem [resolvable:$false] %s1097_s27 }
  0x12   : > { %s1099_s28 = scalar_lea.vmem (!%p172_p10), %s1098_s27, 16384 }
  0x14   : > { %v255_v0 = vld [vmem:[%s1632_s2 + $0x10] sm:$0xff]  ;;  %v1171_v1 = vmov 0.0   ;;  %v253_v2 = vld [vmem:[%s1632_s2] sm:$0xff]  ;;  %s206_s30 = scalar_select %p205_p11, %s1161_s15, 1  ;;  %v1172_v3 = vmov 0   ;;  %v256_v4 = vld [vmem:[%s1632_s2 + $0x18] sm:$0xff] }
  0x15   : > { %613 = vmatprep.mubr.f32.mxu0 %v1171_v1  ;;  %709 = vmatprep.mubr.f32.mxu1 %v1171_v1  ;;  %v254_v5 = vld [vmem:[%s1632_s2 + $0x8] sm:$0xff]  ;;  %vm544_vm0 = vcmask 1043456   ;;  %vm447_vm1 = vcmask 31744   ;;  %v257_v11 = vld [vmem:[%s1632_s2 + $0x20] sm:$0xff]  ;;  %v260_v14 = vld [vmem:[%s1632_s2 + $0x38] sm:$0xff] }
  0x16   : > { %1091 = vset.pattern.permute.xlu1 %v1172_v3  ;;  %1090 = vset.pattern.permute.xlu0 %v1172_v3  ;;  %s1026_s4 = sshll.u32 %s206_s30, 3  ;;  %s1027_s5 = sshll.u32 %s206_s30, 8  ;;  %v258_v10 = vld [vmem:[%s1632_s2 + $0x28] sm:$0xff]  ;;  %v259_v15 = vld [vmem:[%s1632_s2 + $0x30] sm:$0xff]  ;;  %v261_v19 = vld [vmem:[%s1632_s2 + $0x40] sm:$0xff] }
  0x17   : > { %297 = vperm.xlu1 %1091, %v255_v0   ;;  %287 = vperm.xlu0 %1090, %v253_v2   ;;  %s212_s18 = scalar_lea.vmem %s1630_s0, %s1026_s4  ;;  %s1273_s23 = scalar_lea.vmem %s1631_s1, %s1027_s5  ;;  %v262_v18 = vld [vmem:[%s1632_s2 + $0x48] sm:$0xff]  ;;  %v264_v22 = vld [vmem:[%s1632_s2 + $0x58] sm:$0xff]  ;;  %v263_v23 = vld [vmem:[%s1632_s2 + $0x50] sm:$0xff] }
  0x18   : > { %v252_v6 = vld [vmem:[%s212_s18] sm:$0xff]  ;;  %v221_v12 = vld [vmem:[%s1273_s23 + $0x8] sm:$0xff]  ;;  %v222_v16 = vld [vmem:[%s1273_s23 + $0x10] sm:$0xff] }
  0x19   : > { %v446_v7 = vcombine.high %v252_v6, %v252_v6  ;;  %v220_v8 = vld [vmem:[%s1273_s23] sm:$0xff]  ;;  %v237_v13 = vld [vmem:[%s1273_s23 + $0x88] sm:$0xff]  ;;  %v238_v17 = vld [vmem:[%s1273_s23 + $0x90] sm:$0xff] }
  0x1a   : > { %v236_v9 = vld [vmem:[%s1273_s23 + $0x80] sm:$0xff]  ;;  %v223_v20 = vld [vmem:[%s1273_s23 + $0x18] sm:$0xff]  ;;  %v266_v26 = vld [vmem:[%s1632_s2 + $0x68] sm:$0xff] }
  0x1b   : > { %302 = vperm.xlu1 %1091, %v256_v4   ;;  %292 = vperm.xlu0 %1090, %v254_v5   ;;  %v239_v21 = vld [vmem:[%s1273_s23 + $0x98] sm:$0xff]  ;;  %v224_v24 = vld [vmem:[%s1273_s23 + $0x20] sm:$0xff]  ;;  %v225_v28 = vld [vmem:[%s1273_s23 + $0x28] sm:$0xff] }
  0x1c   : > { %987 = vmatprep.subr.msk.mxu0 %vm544_vm0, %v446_v7  ;;  %1029 = vmatprep.subr.msk.mxu1 %vm544_vm0, %v446_v7  ;;  %v240_v25 = vld [vmem:[%s1273_s23 + $0xa0] sm:$0xff]  ;;  %v241_v29 = vld [vmem:[%s1273_s23 + $0xa8] sm:$0xff]  ;;  %v268_v30 = vld [vmem:[%s1632_s2 + $0x78] sm:$0xff] }
  0x1d   : > { %988 = vmatpush1.msk.msra.mxu0 %vm544_vm0, %v252_v6  ;;  %1030 = vmatpush1.msk.msra.mxu1 %vm544_vm0, %v252_v6  ;;  %v265_v27 = vld [vmem:[%s1632_s2 + $0x60] sm:$0xff]  ;;  %v267_v31 = vld [vmem:[%s1632_s2 + $0x70] sm:$0xff]  ;;  %v270_v34 = vld [vmem:[%s1632_s2 + $0x88] sm:$0xff] }
  0x1e   : > { %989 = vmatmul.mubr.msk.f32.vlgmr.msra.gmra.mxu0 %vm447_vm1, %v220_v8  ;;  %1005 = vmatmul.mubr.msk.f32.vlgmr.msra.gmra.mxu1 %vm447_vm1, %v236_v9  ;;  %v226_v32 = vld [vmem:[%s1273_s23 + $0x30] sm:$0xff]  ;;  %v269_v35 = vld [vmem:[%s1632_s2 + $0x80] sm:$0xff]  ;;  %v227_v36 = vld [vmem:[%s1273_s23 + $0x38] sm:$0xff] }
  0x1f   : > { %619 = vmatprep.mubr.f32.mxu0 %v1171_v1  ;;  %715 = vmatprep.mubr.f32.mxu1 %v1171_v1  ;;  %v242_v33 = vld [vmem:[%s1273_s23 + $0xb0] sm:$0xff]  ;;  %v243_v37 = vld [vmem:[%s1273_s23 + $0xb8] sm:$0xff]  ;;  %v228_v40 = vld [vmem:[%s1273_s23 + $0x40] sm:$0xff] }
  0x20   : > { %312 = vperm.xlu1 %1091, %v258_v10   ;;  %307 = vperm.xlu0 %1090, %v257_v11   ;;  %v272_v38 = vld [vmem:[%s1632_s2 + $0x98] sm:$0xff]  ;;  %v271_v39 = vld [vmem:[%s1632_s2 + $0x90] sm:$0xff]  ;;  %v244_v41 = vld [vmem:[%s1273_s23 + $0xc0] sm:$0xff] }
  0x21   : > { %v274_v42 = vld [vmem:[%s1632_s2 + $0xa8] sm:$0xff]  ;;  %v273_v43 = vld [vmem:[%s1632_s2 + $0xa0] sm:$0xff]  ;;  %v276_v46 = vld [vmem:[%s1632_s2 + $0xb8] sm:$0xff] }
  0x22   : > { %990 = vmatmul.mubr.msk.f32.gmra.mxu0 %vm447_vm1, %v221_v12  ;;  %1006 = vmatmul.mubr.msk.f32.gmra.mxu1 %vm447_vm1, %v237_v13  ;;  %v229_v44 = vld [vmem:[%s1273_s23 + $0x48] sm:$0xff]  ;;  %v275_v47 = vld [vmem:[%s1632_s2 + $0xb0] sm:$0xff]  ;;  %v277_v51 = vld [vmem:[%s1632_s2 + $0xc0] sm:$0xff] }
  0x23   : > { %625 = vmatprep.mubr.f32.mxu0 %v1171_v1  ;;  %721 = vmatprep.mubr.f32.mxu1 %v1171_v1  ;;  %v245_v45 = vld [vmem:[%s1273_s23 + $0xc8] sm:$0xff]  ;;  %v230_v48 = vld [vmem:[%s1273_s23 + $0x50] sm:$0xff]  ;;  %v231_v52 = vld [vmem:[%s1273_s23 + $0x58] sm:$0xff] }
  0x24   : > { %322 = vperm.xlu1 %1091, %v260_v14   ;;  %317 = vperm.xlu0 %1090, %v259_v15   ;;  %v246_v49 = vld [vmem:[%s1273_s23 + $0xd0] sm:$0xff]  ;;  %v278_v50 = vld [vmem:[%s1632_s2 + $0xc8] sm:$0xff]  ;;  %v247_v53 = vld [vmem:[%s1273_s23 + $0xd8] sm:$0xff] }
  0x25   : > { %v280_v54 = vld [vmem:[%s1632_s2 + $0xd8] sm:$0xff]  ;;  %v279_v55 = vld [vmem:[%s1632_s2 + $0xd0] sm:$0xff]  ;;  %v232_v56 = vld [vmem:[%s1273_s23 + $0x60] sm:$0xff] }
  0x26   : > { %991 = vmatmul.mubr.msk.f32.gmra.mxu0 %vm447_vm1, %v222_v16  ;;  %1007 = vmatmul.mubr.msk.f32.gmra.mxu1 %vm447_vm1, %v238_v17  ;;  %v248_v57 = vld [vmem:[%s1273_s23 + $0xe0] sm:$0xff]  ;;  %v282_v58 = vld [vmem:[%s1632_s2 + $0xe8] sm:$0xff]  ;;  %v284_v62 = vld [vmem:[%s1632_s2 + $0xf8] sm:$0xff] }
  0x27   : > { %631 = vmatprep.mubr.f32.mxu0 %v1171_v1  ;;  %727 = vmatprep.mubr.f32.mxu1 %v1171_v1  ;;  %v281_v59 = vld [vmem:[%s1632_s2 + $0xe0] sm:$0xff]  ;;  %v233_v60 = vld [vmem:[%s1273_s23 + $0x68] sm:$0xff]  ;;  %v283_v63 = vld [vmem:[%s1632_s2 + $0xf0] sm:$0xff] }
  0x28   : > { %332 = vperm.xlu1 %1091, %v262_v18   ;;  %327 = vperm.xlu0 %1090, %v261_v19   ;;  %v249_v61 = vld [vmem:[%s1273_s23 + $0xe8] sm:$0xff]  ;;  %v234_v0 = vld [vmem:[%s1273_s23 + $0x70] sm:$0xff]  ;;  %v235_v3 = vld [vmem:[%s1273_s23 + $0x78] sm:$0xff] }
  0x29   : > { %v250_v2 = vld [vmem:[%s1273_s23 + $0xf0] sm:$0xff]  ;;  %v251_v4 = vld [vmem:[%s1273_s23 + $0xf8] sm:$0xff]  ;;  %s201_s23 = sand.u32 1, %s1153_s13  }
  0x2a   : > { %992 = vmatmul.mubr.msk.f32.gmra.mxu0 %vm447_vm1, %v223_v20  ;;  %1008 = vmatmul.mubr.msk.f32.gmra.mxu1 %vm447_vm1, %v239_v21  ;;  %s982_s7 = sshll.u32 %s201_s23, 9  ;;  %s1585_s15 = scalar_lea.sflag [#allocation3], %s201_s23 }
  0x2b   : > { %637 = vmatprep.mubr.f32.mxu0 %v1171_v1  ;;  %733 = vmatprep.mubr.f32.mxu1 %v1171_v1  ;;  %s1482_s8 = scalar_lea.vmem [#allocation2], %s982_s7 }
  0x2c   : > { %342 = vperm.xlu1 %1091, %v264_v22   ;;  %337 = vperm.xlu0 %1090, %v263_v23   ;;  %s886_s10 = sshll.u32 %s1482_s8, 4  ;;  %s1576_s10 = int_to_ptr.vmem [resolvable:$true] %s886_s10 }
  0x2d   : > { %s1093_s21 = scalar_lea.vmem %s1576_s10, 8192  ;;  %p1100_p1 = scmp.lt.s32.totalorder %s1576_s10, %s1098_s27 }
  0x2e   : > { %993 = vmatmul.mubr.msk.f32.gmra.mxu0 %vm447_vm1, %v224_v24  ;;  %1009 = vmatmul.mubr.msk.f32.gmra.mxu1 %vm447_vm1, %v240_v25  ;;  %p1094_p12 = scmp.ne.s32.totalorder %s1576_s10, %s1093_s21  ;;  %p1101_p2 = scmp.lt.s32.totalorder %s1099_s28, %s1093_s21 }
  0x2f   : > { %643 = vmatprep.mubr.f32.mxu0 %v1171_v1  ;;  %739 = vmatprep.mubr.f32.mxu1 %v1171_v1 }
  0x30   : > { %352 = vperm.xlu1 %1091, %v266_v26   ;;  %347 = vperm.xlu0 %1090, %v265_v27   ;;  %p1095_p13 = pnand %p1094_p12, %p1236_p4  ;;  %p1102_p3 = por %p1101_p2, %p1100_p1 }
  0x32   : > { %994 = vmatmul.mubr.msk.f32.gmra.mxu0 %vm447_vm1, %v225_v28  ;;  %1010 = vmatmul.mubr.msk.f32.gmra.mxu1 %vm447_vm1, %v241_v29  ;;  %p1096_p0 = pneg %p1095_p13 }
  0x33   : > { %649 = vmatprep.mubr.f32.mxu0 %v1171_v1  ;;  %745 = vmatprep.mubr.f32.mxu1 %v1171_v1 }
  0x34   : > { %362 = vperm.xlu1 %1091, %v268_v30   ;;  %357 = vperm.xlu0 %1090, %v267_v31   ;;  %p1103_p5 = pnand %p1102_p3, %p1096_p0 }
  0x36   : > { %995 = vmatmul.mubr.msk.f32.gmra.mxu0 %vm447_vm1, %v226_v32  ;;  %1011 = vmatmul.mubr.msk.f32.gmra.mxu1 %vm447_vm1, %v242_v33 }
  0x37   : > { %655 = vmatprep.mubr.f32.mxu0 %v1171_v1  ;;  %751 = vmatprep.mubr.f32.mxu1 %v1171_v1 }
  0x38   : > { %372 = vperm.xlu1 %1091, %v270_v34   ;;  %367 = vperm.xlu0 %1090, %v269_v35  }
  0x3a   : > { %996 = vmatmul.mubr.msk.f32.gmra.mxu0 %vm447_vm1, %v227_v36  ;;  %1012 = vmatmul.mubr.msk.f32.gmra.mxu1 %vm447_vm1, %v243_v37 }
  0x3b   : > { %661 = vmatprep.mubr.f32.mxu0 %v1171_v1  ;;  %757 = vmatprep.mubr.f32.mxu1 %v1171_v1 }
  0x3c   : > { %382 = vperm.xlu1 %1091, %v272_v38   ;;  %377 = vperm.xlu0 %1090, %v271_v39  }
  0x3e   : > { %997 = vmatmul.mubr.msk.f32.gmra.mxu0 %vm447_vm1, %v228_v40  ;;  %1013 = vmatmul.mubr.msk.f32.gmra.mxu1 %vm447_vm1, %v244_v41 }
  0x3f   : > { %667 = vmatprep.mubr.f32.mxu0 %v1171_v1  ;;  %763 = vmatprep.mubr.f32.mxu1 %v1171_v1 }
  0x40   : > { %392 = vperm.xlu1 %1091, %v274_v42   ;;  %387 = vperm.xlu0 %1090, %v273_v43  }
  0x42   : > { %998 = vmatmul.mubr.msk.f32.gmra.mxu0 %vm447_vm1, %v229_v44  ;;  %1014 = vmatmul.mubr.msk.f32.gmra.mxu1 %vm447_vm1, %v245_v45 }
  0x43   : > { %673 = vmatprep.mubr.f32.mxu0 %v1171_v1  ;;  %769 = vmatprep.mubr.f32.mxu1 %v1171_v1 }
  0x44   : > { %402 = vperm.xlu1 %1091, %v276_v46   ;;  %397 = vperm.xlu0 %1090, %v275_v47  }
  0x46   : > { %999 = vmatmul.mubr.msk.f32.gmra.mxu0 %vm447_vm1, %v230_v48  ;;  %1015 = vmatmul.mubr.msk.f32.gmra.mxu1 %vm447_vm1, %v246_v49 }
  0x47   : > { %679 = vmatprep.mubr.f32.mxu0 %v1171_v1  ;;  %775 = vmatprep.mubr.f32.mxu1 %v1171_v1 }
  0x48   : > { %412 = vperm.xlu1 %1091, %v278_v50   ;;  %407 = vperm.xlu0 %1090, %v277_v51  }
  0x4a   : > { %1000 = vmatmul.mubr.msk.f32.gmra.mxu0 %vm447_vm1, %v231_v52  ;;  %1016 = vmatmul.mubr.msk.f32.gmra.mxu1 %vm447_vm1, %v247_v53 }
  0x4b   : > { %685 = vmatprep.mubr.f32.mxu0 %v1171_v1  ;;  %781 = vmatprep.mubr.f32.mxu1 %v1171_v1 }
  0x4c   : > { %422 = vperm.xlu1 %1091, %v280_v54   ;;  %417 = vperm.xlu0 %1090, %v279_v55  }
  0x4e   : > { %1001 = vmatmul.mubr.msk.f32.gmra.mxu0 %vm447_vm1, %v232_v56  ;;  %1017 = vmatmul.mubr.msk.f32.gmra.mxu1 %vm447_vm1, %v248_v57 }
  0x4f   : > { %691 = vmatprep.mubr.f32.mxu0 %v1171_v1  ;;  %787 = vmatprep.mubr.f32.mxu1 %v1171_v1 }
  0x50   : > { %432 = vperm.xlu1 %1091, %v282_v58   ;;  %427 = vperm.xlu0 %1090, %v281_v59  }
  0x52   : > { %1002 = vmatmul.mubr.msk.f32.gmra.mxu0 %vm447_vm1, %v233_v60  ;;  %1018 = vmatmul.mubr.msk.f32.gmra.mxu1 %vm447_vm1, %v249_v61 }
  0x53   : > { %697 = vmatprep.mubr.f32.mxu0 %v1171_v1  ;;  %793 = vmatprep.mubr.f32.mxu1 %v1171_v1 }
  0x54   : > { %442 = vperm.xlu1 %1091, %v284_v62   ;;  %437 = vperm.xlu0 %1090, %v283_v63  }
  0x56   : > { %1003 = vmatmul.mubr.msk.f32.gmra.mxu0 %vm447_vm1, %v234_v0  ;;  %1019 = vmatmul.mubr.msk.f32.gmra.mxu1 %vm447_vm1, %v250_v2 }
  0x57   : > { %703 = vmatprep.mubr.f32.mxu0 %v1171_v1  ;;  %799 = vmatprep.mubr.f32.mxu1 %v1171_v1 }
  0x5a   : > { %1004 = vmatmul.mubr.msk.f32.gmra.mxu0 %vm447_vm1, %v235_v3  ;;  %1020 = vmatmul.mubr.msk.f32.gmra.mxu1 %vm447_vm1, %v251_v4 }
  0x92   : > { %v288_v5 = vpop.permute.xlu0 %287  ;;  %v298_v6 = vpop.permute.xlu1 %297 }
  0x96   : > { %v293_v7 = vpop.permute.xlu0 %292  ;;  %v1453_v8 = vpop.permute.xlu1 %302 }
  0x9b   : > { %v1455_v9 = vpop.permute.xlu0 %307  ;;  %v1457_v10 = vpop.permute.xlu1 %312 }
  0x9f   : > { %v1459_v11 = vpop.permute.xlu0 %317  ;;  %v1461_v1 = vpop.permute.xlu1 %322 }
  0xa3   : > { %v1463_v12 = vpop.permute.xlu0 %327  ;;  %v1465_v13 = vpop.permute.xlu1 %332 }
  0xa7   : > { %v1467_v14 = vpop.permute.xlu0 %337  ;;  %v1469_v15 = vpop.permute.xlu1 %342 }
  0xab   : > { %v1471_v16 = vpop.permute.xlu0 %347  ;;  %v1473_v17 = vpop.permute.xlu1 %352 }
  0xaf   : > { %v1475_v18 = vpop.permute.xlu0 %357  ;;  %v1478_v19 = vpop.permute.xlu1 %362 }
  0xb3   : > { %v368_v20 = vpop.permute.xlu0 %367  ;;  %v373_v27 = vpop.permute.xlu1 %372 }
  0xb7   : > { %v378_v36 = vpop.permute.xlu0 %377  ;;  %v383_v45 = vpop.permute.xlu1 %382 }
  0xbb   : > { %v388_v54 = vpop.permute.xlu0 %387  ;;  %v393_v63 = vpop.permute.xlu1 %392 }
  0xde   : > { %v615_v21 = vpop.f32.mrf.mxu0  ;;  %v711_v22 = vpop.f32.mrf.mxu1 }
  0xdf   : > { %v616_v23 = vadd.f32 %v615_v21, %v288_v5  ;;  %v712_v24 = vadd.f32 %v711_v22, %v368_v20 }
  0xe0   : > { %v617_v25 = vpop.f32.mrf.mxu0  ;;  %v713_v26 = vpop.f32.mrf.mxu1 }
  0xe1   : > { %806 = vst [vmem:[%s1482_s8] sm:$0xff] %v616_v23  ;;  %838 = vst [vmem:[%s1482_s8 + $0x100] sm:$0xff] %v712_v24  ;;  %v618_v28 = vadd.f32 %v617_v25, %v288_v5  ;;  %v714_v29 = vadd.f32 %v713_v26, %v368_v20  ;;  %v398_v20 = vpop.permute.xlu0 %397 }
  0xe2   : > { %v621_v30 = vpop.f32.mrf.mxu0  ;;  %v717_v31 = vpop.f32.mrf.mxu1 }
  0xe3   : > { %807 = vst [vmem:[%s1482_s8 + $0x8] sm:$0xff] %v618_v28  ;;  %839 = vst [vmem:[%s1482_s8 + $0x108] sm:$0xff] %v714_v29  ;;  %v622_v32 = vadd.f32 %v621_v30, %v293_v7  ;;  %v718_v33 = vadd.f32 %v717_v31, %v373_v27  ;;  %v403_v28 = vpop.permute.xlu1 %402 }
  0xe4   : > { %v623_v34 = vpop.f32.mrf.mxu0  ;;  %v719_v35 = vpop.f32.mrf.mxu1 }
  0xe5   : > { %808 = vst [vmem:[%s1482_s8 + $0x10] sm:$0xff] %v622_v32  ;;  %840 = vst [vmem:[%s1482_s8 + $0x110] sm:$0xff] %v718_v33  ;;  %v624_v37 = vadd.f32 %v623_v34, %v293_v7  ;;  %v720_v38 = vadd.f32 %v719_v35, %v373_v27 }
  0xe6   : > { %v627_v39 = vpop.f32.mrf.mxu0  ;;  %v723_v40 = vpop.f32.mrf.mxu1 }
  0xe7   : > { %809 = vst [vmem:[%s1482_s8 + $0x18] sm:$0xff] %v624_v37  ;;  %841 = vst [vmem:[%s1482_s8 + $0x118] sm:$0xff] %v720_v38  ;;  %v628_v41 = vadd.f32 %v627_v39, %v298_v6  ;;  %v724_v42 = vadd.f32 %v723_v40, %v378_v36 }
  0xe8   : > { %v629_v43 = vpop.f32.mrf.mxu0  ;;  %v725_v44 = vpop.f32.mrf.mxu1 }
  0xe9   : > { %810 = vst [vmem:[%s1482_s8 + $0x20] sm:$0xff] %v628_v41  ;;  %842 = vst [vmem:[%s1482_s8 + $0x120] sm:$0xff] %v724_v42  ;;  %v630_v46 = vadd.f32 %v629_v43, %v298_v6  ;;  %v726_v47 = vadd.f32 %v725_v44, %v378_v36  ;;  %v408_v36 = vpop.permute.xlu0 %407  ;;  %v413_v44 = vpop.permute.xlu1 %412 }
  0xea   : > { %v633_v48 = vpop.f32.mrf.mxu0  ;;  %v729_v49 = vpop.f32.mrf.mxu1 }
  0xeb   : > { %811 = vst [vmem:[%s1482_s8 + $0x28] sm:$0xff] %v630_v46  ;;  %843 = vst [vmem:[%s1482_s8 + $0x128] sm:$0xff] %v726_v47  ;;  %v634_v50 = vadd.f32 %v633_v48, %v1453_v8  ;;  %v730_v51 = vadd.f32 %v729_v49, %v383_v45 }
  0xec   : > { %v635_v52 = vpop.f32.mrf.mxu0  ;;  %v731_v53 = vpop.f32.mrf.mxu1 }
  0xed   : > { %812 = vst [vmem:[%s1482_s8 + $0x30] sm:$0xff] %v634_v50  ;;  %844 = vst [vmem:[%s1482_s8 + $0x130] sm:$0xff] %v730_v51  ;;  %v636_v55 = vadd.f32 %v635_v52, %v1453_v8  ;;  %v732_v56 = vadd.f32 %v731_v53, %v383_v45  ;;  %v418_v52 = vpop.permute.xlu0 %417 }
  0xee   : > { %v639_v57 = vpop.f32.mrf.mxu0  ;;  %v735_v58 = vpop.f32.mrf.mxu1 }
  0xef   : > { %813 = vst [vmem:[%s1482_s8 + $0x38] sm:$0xff] %v636_v55  ;;  %845 = vst [vmem:[%s1482_s8 + $0x138] sm:$0xff] %v732_v56  ;;  %v640_v59 = vadd.f32 %v639_v57, %v1455_v9  ;;  %v736_v60 = vadd.f32 %v735_v58, %v388_v54 }
  0xf0   : > { %v641_v61 = vpop.f32.mrf.mxu0  ;;  %v737_v62 = vpop.f32.mrf.mxu1 }
  0xf1   : > { %814 = vst [vmem:[%s1482_s8 + $0x40] sm:$0xff] %v640_v59  ;;  %846 = vst [vmem:[%s1482_s8 + $0x140] sm:$0xff] %v736_v60  ;;  %v642_v0 = vadd.f32 %v641_v61, %v1455_v9  ;;  %v738_v2 = vadd.f32 %v737_v62, %v388_v54  ;;  %v423_v60 = vpop.permute.xlu1 %422 }
  0xf2   : > { %v645_v3 = vpop.f32.mrf.mxu0  ;;  %v741_v4 = vpop.f32.mrf.mxu1 }
  0xf3   : > { %815 = vst [vmem:[%s1482_s8 + $0x48] sm:$0xff] %v642_v0  ;;  %847 = vst [vmem:[%s1482_s8 + $0x148] sm:$0xff] %v738_v2  ;;  %v646_v5 = vadd.f32 %v645_v3, %v1457_v10  ;;  %v742_v6 = vadd.f32 %v741_v4, %v393_v63 }
  0xf4   : > { %v647_v7 = vpop.f32.mrf.mxu0  ;;  %v743_v8 = vpop.f32.mrf.mxu1 }
  0xf5   : > { %816 = vst [vmem:[%s1482_s8 + $0x50] sm:$0xff] %v646_v5  ;;  %848 = vst [vmem:[%s1482_s8 + $0x150] sm:$0xff] %v742_v6  ;;  %v648_v21 = vadd.f32 %v647_v7, %v1457_v10  ;;  %v744_v9 = vadd.f32 %v743_v8, %v393_v63  ;;  %v428_v5 = vpop.permute.xlu0 %427 }
  0xf6   : > { %v651_v22 = vpop.f32.mrf.mxu0  ;;  %v747_v23 = vpop.f32.mrf.mxu1 }
  0xf7   : > { %817 = vst [vmem:[%s1482_s8 + $0x58] sm:$0xff] %v648_v21  ;;  %849 = vst [vmem:[%s1482_s8 + $0x158] sm:$0xff] %v744_v9  ;;  %v652_v24 = vadd.f32 %v651_v22, %v1459_v11  ;;  %v748_v25 = vadd.f32 %v747_v23, %v398_v20  ;;  %v433_v23 = vpop.permute.xlu1 %432 }
  0xf8   : > { %v653_v26 = vpop.f32.mrf.mxu0  ;;  %v749_v27 = vpop.f32.mrf.mxu1 }
  0xf9   : > { %818 = vst [vmem:[%s1482_s8 + $0x60] sm:$0xff] %v652_v24  ;;  %850 = vst [vmem:[%s1482_s8 + $0x160] sm:$0xff] %v748_v25  ;;  %v654_v29 = vadd.f32 %v653_v26, %v1459_v11  ;;  %v750_v10 = vadd.f32 %v749_v27, %v398_v20 }
  0xfa   : > { %v657_v30 = vpop.f32.mrf.mxu0  ;;  %v753_v31 = vpop.f32.mrf.mxu1 }
  0xfb   : > { %819 = vst [vmem:[%s1482_s8 + $0x68] sm:$0xff] %v654_v29  ;;  %851 = vst [vmem:[%s1482_s8 + $0x168] sm:$0xff] %v750_v10  ;;  %v658_v32 = vadd.f32 %v657_v30, %v1461_v1  ;;  %v754_v33 = vadd.f32 %v753_v31, %v403_v28  ;;  %v438_v30 = vpop.permute.xlu0 %437 }
  0xfc   : > { %v659_v34 = vpop.f32.mrf.mxu0  ;;  %v755_v35 = vpop.f32.mrf.mxu1 }
  0xfd   : > { %820 = vst [vmem:[%s1482_s8 + $0x70] sm:$0xff] %v658_v32  ;;  %852 = vst [vmem:[%s1482_s8 + $0x170] sm:$0xff] %v754_v33  ;;  %v660_v37 = vadd.f32 %v659_v34, %v1461_v1  ;;  %v756_v11 = vadd.f32 %v755_v35, %v403_v28 }
  0xfe   : > { %v663_v38 = vpop.f32.mrf.mxu0  ;;  %v759_v39 = vpop.f32.mrf.mxu1 }
  0xff   : > { %821 = vst [vmem:[%s1482_s8 + $0x78] sm:$0xff] %v660_v37  ;;  %853 = vst [vmem:[%s1482_s8 + $0x178] sm:$0xff] %v756_v11  ;;  %v664_v40 = vadd.f32 %v663_v38, %v1463_v12  ;;  %v760_v41 = vadd.f32 %v759_v39, %v408_v36  ;;  %v443_v11 = vpop.permute.xlu1 %442 }
 0x100   : > { %v665_v42 = vpop.f32.mrf.mxu0  ;;  %v761_v43 = vpop.f32.mrf.mxu1 }
 0x101   : > { %822 = vst [vmem:[%s1482_s8 + $0x80] sm:$0xff] %v664_v40  ;;  %854 = vst [vmem:[%s1482_s8 + $0x180] sm:$0xff] %v760_v41  ;;  %v666_v45 = vadd.f32 %v665_v42, %v1463_v12  ;;  %v762_v1 = vadd.f32 %v761_v43, %v408_v36 }
 0x102   : > { %v669_v46 = vpop.f32.mrf.mxu0  ;;  %v765_v47 = vpop.f32.mrf.mxu1 }
 0x103   : > { %823 = vst [vmem:[%s1482_s8 + $0x88] sm:$0xff] %v666_v45  ;;  %855 = vst [vmem:[%s1482_s8 + $0x188] sm:$0xff] %v762_v1  ;;  %v670_v48 = vadd.f32 %v669_v46, %v1465_v13  ;;  %v766_v49 = vadd.f32 %v765_v47, %v413_v44 }
 0x104   : > { %v671_v50 = vpop.f32.mrf.mxu0  ;;  %v767_v51 = vpop.f32.mrf.mxu1 }
 0x105   : > { %824 = vst [vmem:[%s1482_s8 + $0x90] sm:$0xff] %v670_v48  ;;  %856 = vst [vmem:[%s1482_s8 + $0x190] sm:$0xff] %v766_v49  ;;  %v672_v53 = vadd.f32 %v671_v50, %v1465_v13  ;;  %v768_v12 = vadd.f32 %v767_v51, %v413_v44 }
 0x106   : > { %v675_v54 = vpop.f32.mrf.mxu0  ;;  %v771_v55 = vpop.f32.mrf.mxu1 }
 0x107   : > { %825 = vst [vmem:[%s1482_s8 + $0x98] sm:$0xff] %v672_v53  ;;  %857 = vst [vmem:[%s1482_s8 + $0x198] sm:$0xff] %v768_v12  ;;  %v676_v56 = vadd.f32 %v675_v54, %v1467_v14  ;;  %v772_v57 = vadd.f32 %v771_v55, %v418_v52 }
 0x108   : > { %v677_v58 = vpop.f32.mrf.mxu0  ;;  %v773_v59 = vpop.f32.mrf.mxu1 }
 0x109   : > { %826 = vst [vmem:[%s1482_s8 + $0xa0] sm:$0xff] %v676_v56  ;;  %858 = vst [vmem:[%s1482_s8 + $0x1a0] sm:$0xff] %v772_v57  ;;  %v678_v61 = vadd.f32 %v677_v58, %v1467_v14  ;;  %v774_v13 = vadd.f32 %v773_v59, %v418_v52 }
 0x10a   : > { %v681_v62 = vpop.f32.mrf.mxu0  ;;  %v777_v63 = vpop.f32.mrf.mxu1 }
 0x10b   : > { %827 = vst [vmem:[%s1482_s8 + $0xa8] sm:$0xff] %v678_v61  ;;  %859 = vst [vmem:[%s1482_s8 + $0x1a8] sm:$0xff] %v774_v13  ;;  %v682_v0 = vadd.f32 %v681_v62, %v1469_v15  ;;  %v778_v2 = vadd.f32 %v777_v63, %v423_v60 }
 0x10c   : > { %v683_v3 = vpop.f32.mrf.mxu0  ;;  %v779_v4 = vpop.f32.mrf.mxu1 }
 0x10d   : > { %828 = vst [vmem:[%s1482_s8 + $0xb0] sm:$0xff] %v682_v0  ;;  %860 = vst [vmem:[%s1482_s8 + $0x1b0] sm:$0xff] %v778_v2  ;;  %v684_v6 = vadd.f32 %v683_v3, %v1469_v15  ;;  %v780_v14 = vadd.f32 %v779_v4, %v423_v60 }
 0x10e   : > { %v687_v7 = vpop.f32.mrf.mxu0  ;;  %v783_v8 = vpop.f32.mrf.mxu1 }
 0x10f   : > { %829 = vst [vmem:[%s1482_s8 + $0xb8] sm:$0xff] %v684_v6  ;;  %861 = vst [vmem:[%s1482_s8 + $0x1b8] sm:$0xff] %v780_v14  ;;  %v688_v20 = vadd.f32 %v687_v7, %v1471_v16  ;;  %v784_v21 = vadd.f32 %v783_v8, %v428_v5 }
 0x110   : > { %v689_v9 = vpop.f32.mrf.mxu0  ;;  %v785_v22 = vpop.f32.mrf.mxu1 }
 0x111   : > { %830 = vst [vmem:[%s1482_s8 + $0xc0] sm:$0xff] %v688_v20  ;;  %862 = vst [vmem:[%s1482_s8 + $0x1c0] sm:$0xff] %v784_v21  ;;  %v690_v24 = vadd.f32 %v689_v9, %v1471_v16  ;;  %v786_v15 = vadd.f32 %v785_v22, %v428_v5 }
 0x112   : > { %v693_v25 = vpop.f32.mrf.mxu0  ;;  %v789_v26 = vpop.f32.mrf.mxu1 }
 0x113   : > { %831 = vst [vmem:[%s1482_s8 + $0xc8] sm:$0xff] %v690_v24  ;;  %863 = vst [vmem:[%s1482_s8 + $0x1c8] sm:$0xff] %v786_v15  ;;  %v694_v27 = vadd.f32 %v693_v25, %v1473_v17  ;;  %v790_v28 = vadd.f32 %v789_v26, %v433_v23 }
 0x114   : > { %v695_v29 = vpop.f32.mrf.mxu0  ;;  %v791_v10 = vpop.f32.mrf.mxu1 }
 0x115   : > { %832 = vst [vmem:[%s1482_s8 + $0xd0] sm:$0xff] %v694_v27  ;;  %864 = vst [vmem:[%s1482_s8 + $0x1d0] sm:$0xff] %v790_v28  ;;  %v696_v16 = vadd.f32 %v695_v29, %v1473_v17  ;;  %v792_v31 = vadd.f32 %v791_v10, %v433_v23 }
 0x116   : > { %v699_v32 = vpop.f32.mrf.mxu0  ;;  %v795_v33 = vpop.f32.mrf.mxu1 }
 0x117   : > { %833 = vst [vmem:[%s1482_s8 + $0xd8] sm:$0xff] %v696_v16  ;;  %865 = vst [vmem:[%s1482_s8 + $0x1d8] sm:$0xff] %v792_v31  ;;  %v700_v34 = vadd.f32 %v699_v32, %v1475_v18  ;;  %v796_v35 = vadd.f32 %v795_v33, %v438_v30 }
 0x118   : > { %v701_v36 = vpop.f32.mrf.mxu0  ;;  %v797_v37 = vpop.f32.mrf.mxu1 }
 0x119   : > { %834 = vst [vmem:[%s1482_s8 + $0xe0] sm:$0xff] %v700_v34  ;;  %866 = vst [vmem:[%s1482_s8 + $0x1e0] sm:$0xff] %v796_v35  ;;  %v702_v17 = vadd.f32 %v701_v36, %v1475_v18  ;;  %v798_v38 = vadd.f32 %v797_v37, %v438_v30 }
 0x11a   : > { %v705_v39 = vpop.f32.mrf.mxu0  ;;  %v801_v40 = vpop.f32.mrf.mxu1 }
 0x11b   : > { %835 = vst [vmem:[%s1482_s8 + $0xe8] sm:$0xff] %v702_v17  ;;  %867 = vst [vmem:[%s1482_s8 + $0x1e8] sm:$0xff] %v798_v38  ;;  %v706_v41 = vadd.f32 %v705_v39, %v1478_v19  ;;  %v802_v42 = vadd.f32 %v801_v40, %v443_v11 }
 0x11c   : > { %v707_v43 = vpop.f32.mrf.mxu0  ;;  %v803_v44 = vpop.f32.mrf.mxu1 }
 0x11d   : > { %836 = vst [vmem:[%s1482_s8 + $0xf0] sm:$0xff] %v706_v41  ;;  %868 = vst [vmem:[%s1482_s8 + $0x1f0] sm:$0xff] %v802_v42  ;;  %v708_v18 = vadd.f32 %v707_v43, %v1478_v19  ;;  %v804_v45 = vadd.f32 %v803_v44, %v443_v11 }
 0x11f   : > { %837 = vst [vmem:[%s1482_s8 + $0xf8] sm:$0xff] %v708_v18  ;;  %869 = vst [vmem:[%s1482_s8 + $0x1f8] sm:$0xff] %v804_v45 }
 0x120   : > { %1106 = shalt.err (!%p1103_p5)
}
 0x121   : > { %s1107_s29 = scalar_lea.hbm %s1574_s19, 8192  ;;  %s1111_s5 = scalar_lea.hbm %s1633_s3, 16384 }
 0x122   : > { %p1108_p6 = scmp.ne.s32.totalorder %s1574_s19, %s1107_s29  ;;  %p1112_p10 = scmp.lt.s32.totalorder %s1574_s19, %s1633_s3 }
 0x123   : > { %p1113_p11 = scmp.lt.s32.totalorder %s1111_s5, %s1107_s29 }
 0x124   : > { %p1109_p7 = pnand %p1108_p6, %p1236_p4 }
 0x125   : > { %p1114_p12 = por %p1113_p11, %p1112_p10 }
 0x126   : > { %p1110_p9 = pneg %p1109_p7 }
 0x128   : > { %p1115_p13 = pnand %p1114_p12, %p1110_p9 }
 0x12a   : > { %1118 = shalt.err (!%p1115_p13)
}
 0x12b   : > { %s1174_s7 = smov 256   ;;  %s1175_s8 = smov 16  }
 0x12c   : > { %1031 = dma.vmem_to_hbm [thread:$0]  (%p1236_p4), %s1576_s10, 8192, %s1574_s19, %s1585_s15, %s1174_s7, %s1174_s7, %s1175_s8  }
 0x12d PF: > { %p1037_p0 = scmp.ge.s32.totalorder %s1169_s17, 2  ;;  %s901_s9 = sand.u32 1, %s1149_s12  }
 0x12e   : > { %s902_s11 = scalar_lea.sflag [#allocation3], %s901_s9 }
 0x12f   : > { %p1034_p1 = pnand %p1037_p0, %p1243_p8 }
 0x131   : > { %p1035_p2 = pneg %p1034_p1 }
 0x133   : > { %1144 = dma.done.wait (%p1035_p2), %s902_s11, 8192  }
 0x134   : > { %1146 = vsyncadd (%p1035_p2), %s902_s11, 4294959104  ;;  %s16_s17 = sadd.s32 1, %s1169_s17   ;;  %s1636_s12 = smov %s1153_s13 }
 0x135   : > { %p13_p3 = scmp.ge.s32.totalorder %s16_s17, 4   ;;  %s1637_s13 = smov %s1157_s14 }
 0x136   : > { %s1638_s14 = smov %s1249_s25  ;;  %s1639_s15 = smov %s1165_s16 }
 0x137   : > { %s1640_s16 = smov %s1642_s20  ;;  %15 = sbr.rel (!%p13_p3) target bundleno = 4 (0x4), region = 70 }
 0x13c   :  { %907 = vsyncpa [#allocation3], 1 }
 0x13d   :  { %909 = vsyncpa [#allocation3 + $0x1], 1 }

</bundles_post_ra>
